<compile_context>
chip_gen: v7x
topology: tpu7x:2x2x1
jax: 0.10.0
libtpu: 0.0.40
codegen_flags: <defaults>
</compile_context>

<pallas_src>
import functools

import jax
import jax.numpy as jnp
from jax.experimental import pallas as pl
from jax.experimental.pallas import tpu as pltpu

WIN = 11          # window_size from SSIMLoss.__init__
K1 = 0.01
K2 = 0.03
DATA_RANGE = 1.0  # data_range=1.0 in the reference


def _ssim_kernel(x_ref, y_ref, bw_ref, bht_ref, o_ref, *, win, tb):
    # x_ref, y_ref: (TB, 1, H, W)  channel-0 slab of TB images (NCHW layout).
    # bw_ref:  (W, Wo) 0/1 band matrix (column window sums).
    # bht_ref: (Ho, H) 0/1 band matrix (row window sums).
    # o_ref:   (1, TB, 128) lane-dense per-image SSIM means (all lanes equal).
    H, W = x_ref.shape[2], x_ref.shape[3]
    Ho, Wo = H - win + 1, W - win + 1

    np_win = float(win * win)
    inv_np = 1.0 / np_win
    cov_norm = np_win / (np_win - 1.0)      # sample covariance (skimage default)
    c1 = (K1 * DATA_RANGE) ** 2
    c2 = (K2 * DATA_RANGE) ** 2
    inv_out = 1.0 / float(Ho * Wo)

    bw = bw_ref[...]                         # (W, Wo)
    bht = bht_ref[...]                       # (Ho, H)

    def box_mean(img):
        # Separable "valid" sliding-window mean as two MXU matmuls.
        col = jnp.dot(img, bw, preferred_element_type=jnp.float32)       # (H, Wo)
        return jnp.dot(bht, col, preferred_element_type=jnp.float32) * inv_np

    means = []
    for i in range(tb):                      # static unroll over the batch tile
        x = x_ref[i, 0].astype(jnp.float32)
        y = y_ref[i, 0].astype(jnp.float32)

        ux = box_mean(x)
        uy = box_mean(y)
        uxx = box_mean(x * x)
        uyy = box_mean(y * y)
        uxy = box_mean(x * y)

        vx = cov_norm * (uxx - ux * ux)
        vy = cov_norm * (uyy - uy * uy)
        vxy = cov_norm * (uxy - ux * uy)

        num = (2.0 * ux * uy + c1) * (2.0 * vxy + c2)
        den = (ux * ux + uy * uy + c1) * (vx + vy + c2)
        s_map = num * pl.reciprocal(den)     # exact reciprocal (EUP path)

        row = jnp.sum(s_map, axis=-1, keepdims=True)     # (Ho, 1) lane reduce
        tot = jnp.sum(row, axis=0, keepdims=True)        # (1, 1)  sublane reduce
        means.append(tot * inv_out)

    per_img = jnp.concatenate(means, axis=0).reshape(1, tb, 1)
    o_ref[...] = jnp.broadcast_to(per_img, (1, tb, 128))


def ssim_loss(x, y, window_size=WIN):
    """1 - mean_b SSIM(x[b, 0], y[b, 0]); x, y are NCHW float arrays."""
    B, C, H, W = x.shape
    if H < window_size or W < window_size:
        raise ValueError(
            f"Spatial dims ({H}, {W}) must be >= window_size ({window_size}).")
    Ho, Wo = H - window_size + 1, W - window_size + 1

    # Images per grid step: largest divisor of B that is <= 8.
    tb = 1
    for d in range(1, min(B, 8) + 1):
        if B % d == 0:
            tb = d
    n_blocks = B // tb

    # 0/1 band matrices for the separable valid box filter (exact in f32).
    c = jnp.arange(W)[:, None]
    j = jnp.arange(Wo)[None, :]
    bw = ((c >= j) & (c < j + window_size)).astype(jnp.float32)         # (W, Wo)
    i = jnp.arange(Ho)[:, None]
    r = jnp.arange(H)[None, :]
    bht = ((r >= i) & (r < i + window_size)).astype(jnp.float32)        # (Ho, H)

    # Explicit VMEM budget: double-buffered inputs + band matrices + output +
    # live f32 intermediates for one image, with margin.
    itemsize = jnp.dtype(x.dtype).itemsize
    vmem_est = (
        2 * 2 * tb * H * W * itemsize        # x, y blocks, double-buffered
        + 2 * 2 * (W * Wo + Ho * H) * 4      # band matrices
        + 2 * tb * 128 * 4                   # output block
        + 24 * H * W * 4                     # f32 temporaries per image
        + (4 << 20)
    )
    vmem_limit = int(min(max(vmem_est, 16 << 20), 64 << 20))

    kernel = functools.partial(_ssim_kernel, win=window_size, tb=tb)
    out = pl.pallas_call(
        kernel,
        out_shape=jax.ShapeDtypeStruct((n_blocks, tb, 128), jnp.float32),
        grid_spec=pltpu.PrefetchScalarGridSpec(
            num_scalar_prefetch=0,
            grid=(n_blocks,),
            in_specs=[
                pl.BlockSpec((tb, 1, H, W), lambda b: (b, 0, 0, 0)),
                pl.BlockSpec((tb, 1, H, W), lambda b: (b, 0, 0, 0)),
                pl.BlockSpec((W, Wo), lambda b: (0, 0)),
                pl.BlockSpec((Ho, H), lambda b: (0, 0)),
            ],
            out_specs=pl.BlockSpec((1, tb, 128), lambda b: (b, 0, 0)),
        ),
        compiler_params=pltpu.CompilerParams(
            dimension_semantics=("parallel",),
            vmem_limit_bytes=vmem_limit,
        ),
    )(x, y, bw, bht)

    per_image_ssim = out[:, :, 0].reshape(B)
    return 1.0 - jnp.mean(per_image_ssim)


def _ssim_loss_ref(x, y, win=WIN):
    """Pure-JAX reference matching skimage.structural_similarity defaults."""
    def one(xi, yi):
        Ho, Wo = xi.shape[0] - win + 1, xi.shape[1] - win + 1
        np_win = win * win
        cov_norm = np_win / (np_win - 1.0)

        def wmean(img):
            s = sum(img[:, k:k + Wo] for k in range(win))
            t = sum(s[k:k + Ho, :] for k in range(win))
            return t / np_win

        ux, uy = wmean(xi), wmean(yi)
        uxx, uyy, uxy = wmean(xi * xi), wmean(yi * yi), wmean(xi * yi)
        vx = cov_norm * (uxx - ux * ux)
        vy = cov_norm * (uyy - uy * uy)
        vxy = cov_norm * (uxy - ux * uy)
        c1 = (K1 * DATA_RANGE) ** 2
        c2 = (K2 * DATA_RANGE) ** 2
        s = ((2 * ux * uy + c1) * (2 * vxy + c2)) / \
            ((ux * ux + uy * uy + c1) * (vx + vy + c2))
        return jnp.mean(s)

    ss = jnp.stack([one(x[b, 0].astype(jnp.float32),
                        y[b, 0].astype(jnp.float32))
                    for b in range(x.shape[0])])
    return 1.0 - jnp.mean(ss)


if __name__ == "__main__":
    key = jax.random.PRNGKey(0)
    kx, ky = jax.random.split(key)
    B, C, H, W = 2, 4, 16, 16          # spatial >= window_size (11)
    x = jax.random.uniform(kx, (B, C, H, W), dtype=jnp.float32)
    y = jax.random.uniform(ky, (B, C, H, W), dtype=jnp.float32)

    loss = jax.jit(ssim_loss)(x, y)
    loss = jax.block_until_ready(loss)

    ref = _ssim_loss_ref(x, y)
    assert jnp.allclose(loss, ref, rtol=1e-5, atol=1e-5), (loss, ref)
    print("KERNEL_OK")
</pallas_src>

<mosaic_0001>
module attributes {stable_mosaic.version = 11 : i64} {
  func.func @_ssim_kernel(%arg0: i32, %arg1: memref<2x1x16x16xf32, #tpu.memory_space<vmem>>, %arg2: memref<2x1x16x16xf32, #tpu.memory_space<vmem>>, %arg3: memref<16x6xf32, #tpu.memory_space<vmem>>, %arg4: memref<6x16xf32, #tpu.memory_space<vmem>>, %arg5: memref<1x2x128xf32, #tpu.memory_space<vmem>>) attributes {dimension_semantics = [#tpu.dimension_semantics<parallel>], iteration_bounds = array<i64: 1>, scalar_prefetch = 0 : i64, scratch_operands = 0 : i64, tpu.core_type = #tpu.core_type<tc>, window_params = [{transform_indices = @transform_0, window_bounds = array<i64: 2, 1, 16, 16>}, {transform_indices = @transform_1, window_bounds = array<i64: 2, 1, 16, 16>}, {pipeline_mode = #tpu.pipeline_mode<synchronous>, transform_indices = @transform_2, window_bounds = array<i64: 16, 6>}, {pipeline_mode = #tpu.pipeline_mode<synchronous>, transform_indices = @transform_3, window_bounds = array<i64: 6, 16>}, {transform_indices = @transform_4, window_bounds = array<i64: 1, 2, 128>}]} {
    %c0 = arith.constant 0 : index
    %c0_0 = arith.constant 0 : index
    %0 = vector.load %arg3[%c0, %c0_0] : memref<16x6xf32, #tpu.memory_space<vmem>>, vector<16x6xf32>
    %c0_1 = arith.constant 0 : index
    %c0_2 = arith.constant 0 : index
    %1 = vector.load %arg4[%c0_1, %c0_2] : memref<6x16xf32, #tpu.memory_space<vmem>>, vector<6x16xf32>
    %c0_3 = arith.constant 0 : index
    %c0_4 = arith.constant 0 : index
    %c0_5 = arith.constant 0 : index
    %c0_6 = arith.constant 0 : index
    %2 = vector.load %arg1[%c0_3, %c0_4, %c0_5, %c0_6] : memref<2x1x16x16xf32, #tpu.memory_space<vmem>>, vector<1x1x16x16xf32>
    %3 = vector.shape_cast %2 : vector<1x1x16x16xf32> to vector<16x16xf32>
    %c0_7 = arith.constant 0 : index
    %c0_8 = arith.constant 0 : index
    %c0_9 = arith.constant 0 : index
    %c0_10 = arith.constant 0 : index
    %4 = vector.load %arg2[%c0_7, %c0_8, %c0_9, %c0_10] : memref<2x1x16x16xf32, #tpu.memory_space<vmem>>, vector<1x1x16x16xf32>
    %5 = vector.shape_cast %4 : vector<1x1x16x16xf32> to vector<16x16xf32>
    %cst = arith.constant dense<0.000000e+00> : vector<16x6xf32>
    %6 = tpu.matmul %3, %0, %cst {dimension_numbers = #tpu.dot_dimension_numbers<[1], [0], [0], [1], [0, 0, 1, 1], [], []>} : vector<16x16xf32>, vector<16x6xf32>, vector<16x6xf32> -> vector<16x6xf32>
    %cst_11 = arith.constant dense<0.000000e+00> : vector<6x6xf32>
    %7 = tpu.matmul %1, %6, %cst_11 {dimension_numbers = #tpu.dot_dimension_numbers<[1], [0], [0], [1], [0, 0, 1, 1], [], []>} : vector<6x16xf32>, vector<16x6xf32>, vector<6x6xf32> -> vector<6x6xf32>
    %cst_12 = arith.constant 0.00826446246 : f32
    %8 = vector.broadcast %cst_12 : f32 to vector<6x6xf32>
    %9 = arith.mulf %7, %8 : vector<6x6xf32>
    %cst_13 = arith.constant dense<0.000000e+00> : vector<16x6xf32>
    %10 = tpu.matmul %5, %0, %cst_13 {dimension_numbers = #tpu.dot_dimension_numbers<[1], [0], [0], [1], [0, 0, 1, 1], [], []>} : vector<16x16xf32>, vector<16x6xf32>, vector<16x6xf32> -> vector<16x6xf32>
    %cst_14 = arith.constant dense<0.000000e+00> : vector<6x6xf32>
    %11 = tpu.matmul %1, %10, %cst_14 {dimension_numbers = #tpu.dot_dimension_numbers<[1], [0], [0], [1], [0, 0, 1, 1], [], []>} : vector<6x16xf32>, vector<16x6xf32>, vector<6x6xf32> -> vector<6x6xf32>
    %cst_15 = arith.constant 0.00826446246 : f32
    %12 = vector.broadcast %cst_15 : f32 to vector<6x6xf32>
    %13 = arith.mulf %11, %12 : vector<6x6xf32>
    %14 = arith.mulf %3, %3 : vector<16x16xf32>
    %cst_16 = arith.constant dense<0.000000e+00> : vector<16x6xf32>
    %15 = tpu.matmul %14, %0, %cst_16 {dimension_numbers = #tpu.dot_dimension_numbers<[1], [0], [0], [1], [0, 0, 1, 1], [], []>} : vector<16x16xf32>, vector<16x6xf32>, vector<16x6xf32> -> vector<16x6xf32>
    %cst_17 = arith.constant dense<0.000000e+00> : vector<6x6xf32>
    %16 = tpu.matmul %1, %15, %cst_17 {dimension_numbers = #tpu.dot_dimension_numbers<[1], [0], [0], [1], [0, 0, 1, 1], [], []>} : vector<6x16xf32>, vector<16x6xf32>, vector<6x6xf32> -> vector<6x6xf32>
    %cst_18 = arith.constant 0.00826446246 : f32
    %17 = vector.broadcast %cst_18 : f32 to vector<6x6xf32>
    %18 = arith.mulf %16, %17 : vector<6x6xf32>
    %19 = arith.mulf %5, %5 : vector<16x16xf32>
    %cst_19 = arith.constant dense<0.000000e+00> : vector<16x6xf32>
    %20 = tpu.matmul %19, %0, %cst_19 {dimension_numbers = #tpu.dot_dimension_numbers<[1], [0], [0], [1], [0, 0, 1, 1], [], []>} : vector<16x16xf32>, vector<16x6xf32>, vector<16x6xf32> -> vector<16x6xf32>
    %cst_20 = arith.constant dense<0.000000e+00> : vector<6x6xf32>
    %21 = tpu.matmul %1, %20, %cst_20 {dimension_numbers = #tpu.dot_dimension_numbers<[1], [0], [0], [1], [0, 0, 1, 1], [], []>} : vector<6x16xf32>, vector<16x6xf32>, vector<6x6xf32> -> vector<6x6xf32>
    %cst_21 = arith.constant 0.00826446246 : f32
    %22 = vector.broadcast %cst_21 : f32 to vector<6x6xf32>
    %23 = arith.mulf %21, %22 : vector<6x6xf32>
    %24 = arith.mulf %3, %5 : vector<16x16xf32>
    %cst_22 = arith.constant dense<0.000000e+00> : vector<16x6xf32>
    %25 = tpu.matmul %24, %0, %cst_22 {dimension_numbers = #tpu.dot_dimension_numbers<[1], [0], [0], [1], [0, 0, 1, 1], [], []>} : vector<16x16xf32>, vector<16x6xf32>, vector<16x6xf32> -> vector<16x6xf32>
    %cst_23 = arith.constant dense<0.000000e+00> : vector<6x6xf32>
    %26 = tpu.matmul %1, %25, %cst_23 {dimension_numbers = #tpu.dot_dimension_numbers<[1], [0], [0], [1], [0, 0, 1, 1], [], []>} : vector<6x16xf32>, vector<16x6xf32>, vector<6x6xf32> -> vector<6x6xf32>
    %cst_24 = arith.constant 0.00826446246 : f32
    %27 = vector.broadcast %cst_24 : f32 to vector<6x6xf32>
    %28 = arith.mulf %26, %27 : vector<6x6xf32>
    %29 = arith.mulf %9, %9 : vector<6x6xf32>
    %30 = arith.subf %18, %29 : vector<6x6xf32>
    %cst_25 = arith.constant 1.00833333 : f32
    %31 = vector.broadcast %cst_25 : f32 to vector<6x6xf32>
    %32 = arith.mulf %31, %30 : vector<6x6xf32>
    %33 = arith.mulf %13, %13 : vector<6x6xf32>
    %34 = arith.subf %23, %33 : vector<6x6xf32>
    %cst_26 = arith.constant 1.00833333 : f32
    %35 = vector.broadcast %cst_26 : f32 to vector<6x6xf32>
    %36 = arith.mulf %35, %34 : vector<6x6xf32>
    %37 = arith.mulf %9, %13 : vector<6x6xf32>
    %38 = arith.subf %28, %37 : vector<6x6xf32>
    %cst_27 = arith.constant 1.00833333 : f32
    %39 = vector.broadcast %cst_27 : f32 to vector<6x6xf32>
    %40 = arith.mulf %39, %38 : vector<6x6xf32>
    %cst_28 = arith.constant 2.000000e+00 : f32
    %41 = vector.broadcast %cst_28 : f32 to vector<6x6xf32>
    %42 = arith.mulf %41, %9 : vector<6x6xf32>
    %43 = arith.mulf %42, %13 : vector<6x6xf32>
    %cst_29 = arith.constant 9.99999974E-5 : f32
    %44 = vector.broadcast %cst_29 : f32 to vector<6x6xf32>
    %45 = arith.addf %43, %44 : vector<6x6xf32>
    %cst_30 = arith.constant 2.000000e+00 : f32
    %46 = vector.broadcast %cst_30 : f32 to vector<6x6xf32>
    %47 = arith.mulf %46, %40 : vector<6x6xf32>
    %cst_31 = arith.constant 8.99999984E-4 : f32
    %48 = vector.broadcast %cst_31 : f32 to vector<6x6xf32>
    %49 = arith.addf %47, %48 : vector<6x6xf32>
    %50 = arith.mulf %45, %49 : vector<6x6xf32>
    %51 = arith.mulf %9, %9 : vector<6x6xf32>
    %52 = arith.mulf %13, %13 : vector<6x6xf32>
    %53 = arith.addf %51, %52 : vector<6x6xf32>
    %cst_32 = arith.constant 9.99999974E-5 : f32
    %54 = vector.broadcast %cst_32 : f32 to vector<6x6xf32>
    %55 = arith.addf %53, %54 : vector<6x6xf32>
    %56 = arith.addf %32, %36 : vector<6x6xf32>
    %cst_33 = arith.constant 8.99999984E-4 : f32
    %57 = vector.broadcast %cst_33 : f32 to vector<6x6xf32>
    %58 = arith.addf %56, %57 : vector<6x6xf32>
    %59 = arith.mulf %55, %58 : vector<6x6xf32>
    %60 = tpu.reciprocal %59 : vector<6x6xf32> -> vector<6x6xf32>
    %61 = arith.mulf %50, %60 : vector<6x6xf32>
    %cst_34 = arith.constant dense<0.000000e+00> : vector<6xf32>
    %62 = vector.multi_reduction <add>, %61, %cst_34 [1] : vector<6x6xf32> to vector<6xf32>
    %63 = vector.shape_cast %62 : vector<6xf32> to vector<6x1xf32>
    %cst_35 = arith.constant dense<0.000000e+00> : vector<1xf32>
    %64 = vector.multi_reduction <add>, %63, %cst_35 [0] : vector<6x1xf32> to vector<1xf32>
    %65 = vector.shape_cast %64 : vector<1xf32> to vector<1x1xf32>
    %cst_36 = arith.constant 0.027777778 : f32
    %66 = vector.broadcast %cst_36 : f32 to vector<1x1xf32>
    %67 = arith.mulf %65, %66 : vector<1x1xf32>
    %c1 = arith.constant 1 : index
    %c0_37 = arith.constant 0 : index
    %c0_38 = arith.constant 0 : index
    %c0_39 = arith.constant 0 : index
    %68 = vector.load %arg1[%c1, %c0_37, %c0_38, %c0_39] : memref<2x1x16x16xf32, #tpu.memory_space<vmem>>, vector<1x1x16x16xf32>
    %69 = vector.shape_cast %68 : vector<1x1x16x16xf32> to vector<16x16xf32>
    %c1_40 = arith.constant 1 : index
    %c0_41 = arith.constant 0 : index
    %c0_42 = arith.constant 0 : index
    %c0_43 = arith.constant 0 : index
    %70 = vector.load %arg2[%c1_40, %c0_41, %c0_42, %c0_43] : memref<2x1x16x16xf32, #tpu.memory_space<vmem>>, vector<1x1x16x16xf32>
    %71 = vector.shape_cast %70 : vector<1x1x16x16xf32> to vector<16x16xf32>
    %cst_44 = arith.constant dense<0.000000e+00> : vector<16x6xf32>
    %72 = tpu.matmul %69, %0, %cst_44 {dimension_numbers = #tpu.dot_dimension_numbers<[1], [0], [0], [1], [0, 0, 1, 1], [], []>} : vector<16x16xf32>, vector<16x6xf32>, vector<16x6xf32> -> vector<16x6xf32>
    %cst_45 = arith.constant dense<0.000000e+00> : vector<6x6xf32>
    %73 = tpu.matmul %1, %72, %cst_45 {dimension_numbers = #tpu.dot_dimension_numbers<[1], [0], [0], [1], [0, 0, 1, 1], [], []>} : vector<6x16xf32>, vector<16x6xf32>, vector<6x6xf32> -> vector<6x6xf32>
    %cst_46 = arith.constant 0.00826446246 : f32
    %74 = vector.broadcast %cst_46 : f32 to vector<6x6xf32>
    %75 = arith.mulf %73, %74 : vector<6x6xf32>
    %cst_47 = arith.constant dense<0.000000e+00> : vector<16x6xf32>
    %76 = tpu.matmul %71, %0, %cst_47 {dimension_numbers = #tpu.dot_dimension_numbers<[1], [0], [0], [1], [0, 0, 1, 1], [], []>} : vector<16x16xf32>, vector<16x6xf32>, vector<16x6xf32> -> vector<16x6xf32>
    %cst_48 = arith.constant dense<0.000000e+00> : vector<6x6xf32>
    %77 = tpu.matmul %1, %76, %cst_48 {dimension_numbers = #tpu.dot_dimension_numbers<[1], [0], [0], [1], [0, 0, 1, 1], [], []>} : vector<6x16xf32>, vector<16x6xf32>, vector<6x6xf32> -> vector<6x6xf32>
    %cst_49 = arith.constant 0.00826446246 : f32
    %78 = vector.broadcast %cst_49 : f32 to vector<6x6xf32>
    %79 = arith.mulf %77, %78 : vector<6x6xf32>
    %80 = arith.mulf %69, %69 : vector<16x16xf32>
    %cst_50 = arith.constant dense<0.000000e+00> : vector<16x6xf32>
    %81 = tpu.matmul %80, %0, %cst_50 {dimension_numbers = #tpu.dot_dimension_numbers<[1], [0], [0], [1], [0, 0, 1, 1], [], []>} : vector<16x16xf32>, vector<16x6xf32>, vector<16x6xf32> -> vector<16x6xf32>
    %cst_51 = arith.constant dense<0.000000e+00> : vector<6x6xf32>
    %82 = tpu.matmul %1, %81, %cst_51 {dimension_numbers = #tpu.dot_dimension_numbers<[1], [0], [0], [1], [0, 0, 1, 1], [], []>} : vector<6x16xf32>, vector<16x6xf32>, vector<6x6xf32> -> vector<6x6xf32>
    %cst_52 = arith.constant 0.00826446246 : f32
    %83 = vector.broadcast %cst_52 : f32 to vector<6x6xf32>
    %84 = arith.mulf %82, %83 : vector<6x6xf32>
    %85 = arith.mulf %71, %71 : vector<16x16xf32>
    %cst_53 = arith.constant dense<0.000000e+00> : vector<16x6xf32>
    %86 = tpu.matmul %85, %0, %cst_53 {dimension_numbers = #tpu.dot_dimension_numbers<[1], [0], [0], [1], [0, 0, 1, 1], [], []>} : vector<16x16xf32>, vector<16x6xf32>, vector<16x6xf32> -> vector<16x6xf32>
    %cst_54 = arith.constant dense<0.000000e+00> : vector<6x6xf32>
    %87 = tpu.matmul %1, %86, %cst_54 {dimension_numbers = #tpu.dot_dimension_numbers<[1], [0], [0], [1], [0, 0, 1, 1], [], []>} : vector<6x16xf32>, vector<16x6xf32>, vector<6x6xf32> -> vector<6x6xf32>
    %cst_55 = arith.constant 0.00826446246 : f32
    %88 = vector.broadcast %cst_55 : f32 to vector<6x6xf32>
    %89 = arith.mulf %87, %88 : vector<6x6xf32>
    %90 = arith.mulf %69, %71 : vector<16x16xf32>
    %cst_56 = arith.constant dense<0.000000e+00> : vector<16x6xf32>
    %91 = tpu.matmul %90, %0, %cst_56 {dimension_numbers = #tpu.dot_dimension_numbers<[1], [0], [0], [1], [0, 0, 1, 1], [], []>} : vector<16x16xf32>, vector<16x6xf32>, vector<16x6xf32> -> vector<16x6xf32>
    %cst_57 = arith.constant dense<0.000000e+00> : vector<6x6xf32>
    %92 = tpu.matmul %1, %91, %cst_57 {dimension_numbers = #tpu.dot_dimension_numbers<[1], [0], [0], [1], [0, 0, 1, 1], [], []>} : vector<6x16xf32>, vector<16x6xf32>, vector<6x6xf32> -> vector<6x6xf32>
    %cst_58 = arith.constant 0.00826446246 : f32
    %93 = vector.broadcast %cst_58 : f32 to vector<6x6xf32>
    %94 = arith.mulf %92, %93 : vector<6x6xf32>
    %95 = arith.mulf %75, %75 : vector<6x6xf32>
    %96 = arith.subf %84, %95 : vector<6x6xf32>
    %cst_59 = arith.constant 1.00833333 : f32
    %97 = vector.broadcast %cst_59 : f32 to vector<6x6xf32>
    %98 = arith.mulf %97, %96 : vector<6x6xf32>
    %99 = arith.mulf %79, %79 : vector<6x6xf32>
    %100 = arith.subf %89, %99 : vector<6x6xf32>
    %cst_60 = arith.constant 1.00833333 : f32
    %101 = vector.broadcast %cst_60 : f32 to vector<6x6xf32>
    %102 = arith.mulf %101, %100 : vector<6x6xf32>
    %103 = arith.mulf %75, %79 : vector<6x6xf32>
    %104 = arith.subf %94, %103 : vector<6x6xf32>
    %cst_61 = arith.constant 1.00833333 : f32
    %105 = vector.broadcast %cst_61 : f32 to vector<6x6xf32>
    %106 = arith.mulf %105, %104 : vector<6x6xf32>
    %cst_62 = arith.constant 2.000000e+00 : f32
    %107 = vector.broadcast %cst_62 : f32 to vector<6x6xf32>
    %108 = arith.mulf %107, %75 : vector<6x6xf32>
    %109 = arith.mulf %108, %79 : vector<6x6xf32>
    %cst_63 = arith.constant 9.99999974E-5 : f32
    %110 = vector.broadcast %cst_63 : f32 to vector<6x6xf32>
    %111 = arith.addf %109, %110 : vector<6x6xf32>
    %cst_64 = arith.constant 2.000000e+00 : f32
    %112 = vector.broadcast %cst_64 : f32 to vector<6x6xf32>
    %113 = arith.mulf %112, %106 : vector<6x6xf32>
    %cst_65 = arith.constant 8.99999984E-4 : f32
    %114 = vector.broadcast %cst_65 : f32 to vector<6x6xf32>
    %115 = arith.addf %113, %114 : vector<6x6xf32>
    %116 = arith.mulf %111, %115 : vector<6x6xf32>
    %117 = arith.mulf %75, %75 : vector<6x6xf32>
    %118 = arith.mulf %79, %79 : vector<6x6xf32>
    %119 = arith.addf %117, %118 : vector<6x6xf32>
    %cst_66 = arith.constant 9.99999974E-5 : f32
    %120 = vector.broadcast %cst_66 : f32 to vector<6x6xf32>
    %121 = arith.addf %119, %120 : vector<6x6xf32>
    %122 = arith.addf %98, %102 : vector<6x6xf32>
    %cst_67 = arith.constant 8.99999984E-4 : f32
    %123 = vector.broadcast %cst_67 : f32 to vector<6x6xf32>
    %124 = arith.addf %122, %123 : vector<6x6xf32>
    %125 = arith.mulf %121, %124 : vector<6x6xf32>
    %126 = tpu.reciprocal %125 : vector<6x6xf32> -> vector<6x6xf32>
    %127 = arith.mulf %116, %126 : vector<6x6xf32>
    %cst_68 = arith.constant dense<0.000000e+00> : vector<6xf32>
    %128 = vector.multi_reduction <add>, %127, %cst_68 [1] : vector<6x6xf32> to vector<6xf32>
    %129 = vector.shape_cast %128 : vector<6xf32> to vector<6x1xf32>
    %cst_69 = arith.constant dense<0.000000e+00> : vector<1xf32>
    %130 = vector.multi_reduction <add>, %129, %cst_69 [0] : vector<6x1xf32> to vector<1xf32>
    %131 = vector.shape_cast %130 : vector<1xf32> to vector<1x1xf32>
    %cst_70 = arith.constant 0.027777778 : f32
    %132 = vector.broadcast %cst_70 : f32 to vector<1x1xf32>
    %133 = arith.mulf %131, %132 : vector<1x1xf32>
    %134 = tpu.concatenate %67, %133 in 0 : vector<1x1xf32>, vector<1x1xf32> -> vector<2x1xf32>
    %135 = vector.shape_cast %134 : vector<2x1xf32> to vector<1x2x1xf32>
    %136 = vector.shape_cast %135 : vector<1x2x1xf32> to vector<1x2x1xf32>
    %137 = vector.broadcast %136 : vector<1x2x1xf32> to vector<1x2x128xf32>
    %c0_71 = arith.constant 0 : index
    %c0_72 = arith.constant 0 : index
    %c0_73 = arith.constant 0 : index
    %138 = vector.load %arg5[%c0_71, %c0_72, %c0_73] : memref<1x2x128xf32, #tpu.memory_space<vmem>>, vector<1x2x128xf32>
    tpu.vector_store %arg5[%c0_71, %c0_72, %c0_73], %137 {strides = array<i32>} : memref<1x2x128xf32, #tpu.memory_space<vmem>>, vector<1x2x128xf32>,
    return
  }
  func.func @transform_0(%arg0: i32) -> (i32, i32, i32, i32) {
    %c0_i32 = arith.constant 0 : i32
    %c0_i32_0 = arith.constant 0 : i32
    %c0_i32_1 = arith.constant 0 : i32
    %c0_i32_2 = arith.constant 0 : i32
    return %arg0, %c0_i32, %c0_i32_0, %c0_i32_1 : i32, i32, i32, i32
  }
  func.func @transform_1(%arg0: i32) -> (i32, i32, i32, i32) {
    %c0_i32 = arith.constant 0 : i32
    %c0_i32_0 = arith.constant 0 : i32
    %c0_i32_1 = arith.constant 0 : i32
    %c0_i32_2 = arith.constant 0 : i32
    return %arg0, %c0_i32, %c0_i32_0, %c0_i32_1 : i32, i32, i32, i32
  }
  func.func @transform_2(%arg0: i32) -> (i32, i32) {
    %c0_i32 = arith.constant 0 : i32
    %c0_i32_0 = arith.constant 0 : i32
    %c0_i32_1 = arith.constant 0 : i32
    return %c0_i32, %c0_i32_0 : i32, i32
  }
  func.func @transform_3(%arg0: i32) -> (i32, i32) {
    %c0_i32 = arith.constant 0 : i32
    %c0_i32_0 = arith.constant 0 : i32
    %c0_i32_1 = arith.constant 0 : i32
    return %c0_i32, %c0_i32_0 : i32, i32
  }
  func.func @transform_4(%arg0: i32) -> (i32, i32, i32) {
    %c0_i32 = arith.constant 0 : i32
    %c0_i32_0 = arith.constant 0 : i32
    %c0_i32_1 = arith.constant 0 : i32
    return %arg0, %c0_i32, %c0_i32_0 : i32, i32, i32
  }
}

</mosaic_0001>

<bundles_post_ra>
// kernel: ssim_loss.1
= control target key start
LH: loop header
LB: loop body
LE: loop exit
PB: predicated region body
PF: predicated region fallthrough
CT: control target
= control target key end

     0   :  { %9 = vsyncpa [#allocation3], 0  ;;  %s2207_s0 = inlined_call_operand.hbm [shape: f32[2,4,16,16], index: 0, kind: input, shape index: {}]   ;;  %s2208_s1 = inlined_call_operand.hbm [shape: f32[2,4,16,16], index: 1, kind: input, shape index: {}]   ;;  %s2209_s2 = inlined_call_operand.vmem [shape: f32[16,6], index: 2, kind: input, shape index: {}]   ;;  %s2210_s3 = inlined_call_operand.vmem [shape: f32[6,16], index: 3, kind: input, shape index: {}]   ;;  %s2211_s4 = inlined_call_operand.vmem [shape: f32[1,2,128], index: 4, kind: output, shape index: {}]  }
   0x1   :  { %10 = vsyncpa [#allocation5], 0 }
   0x2   :  { %s20_s15 = sld [smem:[#allocation0]]   ;;  %s2070_s16 = smov [#allocation2]  }
   0x3   :  { %s28_s17 = sshll.u32 %s2070_s16, 4  ;;  %s2071_s18 = smov 1024   ;;  %s29_s17 = int_to_ptr.vmem [resolvable:$true] %s28_s17 }
   0x4   :  { %35 = sst [smem:[#allocation7]] %s2071_s18  ;;  %s2072_s19 = smov 256  }
   0x5   :  { %37 = sst [smem:[#allocation7 + $0x1]] %s2072_s19  ;;  %s2073_s20 = smov 2  }
   0x6   :  { %39 = sst [smem:[#allocation7 + $0x2]] %s2073_s20  ;;  %s2074_s22 = smov 128  }
   0x7   :  { %41 = sst [smem:[#allocation7 + $0x3]] %s2074_s22  ;;  %s2075_s24 = smov 8  }
   0x8   :  { %s1726_s21 = sshll.u32 %s20_s15, 26  ;;  %43 = sst [smem:[#allocation7 + $0x4]] %s2074_s22 }
   0x9   :  { %s1727_s23 = sadd.s32 134217728, %s1726_s21  ;;  %45 = sst [smem:[#allocation7 + $0x5]] %s2075_s24 }
   0xa   :  { %s2076_s25 = smov [#allocation3]   ;;  %s2077_s26 = smov [#allocation6]  }
   0xb   :  { %47 = dma.general %s2207_s0, 512, %s29_s17, %s2076_s25, %s2077_s26, [#allocation7], %s1727_s23, 0  }
   0xc   :  { %s57_s29 = sld [smem:[#allocation0]]   ;;  %s2078_s30 = smov [#allocation4]  }
   0xd   :  { %s65_s5 = sshll.u32 %s2078_s30, 4  ;;  %s2079_s6 = smov 1024   ;;  %s66_s5 = int_to_ptr.vmem [resolvable:$true] %s65_s5 }
   0xe   :  { %72 = sst [smem:[#allocation9]] %s2079_s6  ;;  %s2080_s7 = smov 256  }
   0xf   :  { %74 = sst [smem:[#allocation9 + $0x1]] %s2080_s7  ;;  %s2081_s8 = smov 2  }
  0x10   :  { %76 = sst [smem:[#allocation9 + $0x2]] %s2081_s8  ;;  %s2082_s10 = smov 128  }
  0x11   :  { %78 = sst [smem:[#allocation9 + $0x3]] %s2082_s10  ;;  %s2083_s12 = smov 8  }
  0x12   :  { %s1728_s9 = sshll.u32 %s57_s29, 26  ;;  %80 = sst [smem:[#allocation9 + $0x4]] %s2082_s10 }
  0x13   :  { %s1729_s11 = sadd.s32 134217728, %s1728_s9  ;;  %82 = sst [smem:[#allocation9 + $0x5]] %s2083_s12 }
  0x14   :  { %s2084_s13 = smov [#allocation5]   ;;  %s2085_s14 = smov [#allocation8]  }
  0x15   :  { %84 = dma.general %s2208_s1, 512, %s66_s5, %s2084_s13, %s2085_s14, [#allocation9], %s1729_s11, 0  }
  0x16   :  { %2066 = dma.done.wait [#allocation3], 512  }
  0x17   :  { %2067 = vsyncadd [#allocation3], 4294966784 }
  0x18   :  { %2068 = dma.done.wait [#allocation5], 512  }
  0x19   :  { %2069 = vsyncadd [#allocation5], 4294966784  ;;  %vm102_vm0 = vcmask 130048   ;;  %v95_v0 = vld [vmem:[%s2209_s2] sm:$0xff]  ;;  %v96_v1 = vld [vmem:[%s2209_s2 + $0x8] sm:$0xff]  ;;  %v2086_v23 = vmov 0.0|0.0  }
  0x1a   :  { %v98_v2 = vld [vmem:[#allocation2] sm:$0xff]  ;;  %v1970_v3 = vpack.c.bf16 %v96_v1, %v95_v0  ;;  %v99_v4 = vld [vmem:[#allocation2 + $0x8] sm:$0xff]  ;;  %v908_v13 = vld [vmem:[#allocation2 + $0x10] sm:$0xff]  ;;  %1974 = vmatprep.subr.bf16.mxu1 %v2086_v23  ;;  %vm2087_vm1 = vmmov 0   ;;  %v2088_v24 = vmov 0.0   ;;  %vm894_vm2 = vcmask 46080  }
  0x1b   :  { %1834 = vmatprep.mubr.msk.f32.mxu0 %vm102_vm0, %v98_v2  ;;  %v100_v5 = vld [vmem:[#allocation4] sm:$0xff]  ;;  %v410_v6 = vmul.f32 %v98_v2, %v98_v2  ;;  %v101_v7 = vld [vmem:[#allocation4 + $0x8] sm:$0xff]  ;;  %v411_v8 = vmul.f32 %v99_v4, %v99_v4  ;;  %v909_v14 = vld [vmem:[#allocation2 + $0x18] sm:$0xff]  ;;  %v1217_v16 = vmul.f32 %v908_v13, %v908_v13  ;;  %1841 = vmatprep.mubr.msk.f32.mxu1 %vm2087_vm1, %v2088_v24  ;;  %vm898_vm3 = vcmask 1045504  }
  0x1c   :  { %1971 = vmatprep.subr.bf16.mxu0 %v1970_v3  ;;  %v564_v9 = vmul.f32 %v100_v5, %v100_v5  ;;  %v565_v10 = vmul.f32 %v101_v7, %v101_v7  ;;  %v718_v11 = vmul.f32 %v100_v5, %v98_v2  ;;  %v719_v12 = vmul.f32 %v101_v7, %v99_v4  ;;  %v911_v15 = vld [vmem:[#allocation4 + $0x10] sm:$0xff]  ;;  %v912_v17 = vld [vmem:[#allocation4 + $0x18] sm:$0xff]  ;;  %v2153_v29 = vld [vmem:[%s2210_s3] sm:$0x3f] }
  0x1d   :  { %1973 = vmatpush3.bf16.msra.mxu0 %v1970_v3  ;;  %v1218_v18 = vmul.f32 %v909_v14, %v909_v14  ;;  %v1371_v19 = vmul.f32 %v911_v15, %v911_v15  ;;  %v1372_v20 = vmul.f32 %v912_v17, %v912_v17  ;;  %v1525_v21 = vmul.f32 %v911_v15, %v908_v13 }
  0x1e   :  { %1978 = vmatprep.subr.bf16.mxu0 %v1970_v3  ;;  %v1526_v22 = vmul.f32 %v912_v17, %v909_v14  ;;  %vm1712_vm4 = vcmask 1040384  }
  0x20   :  { %1835 = vmatmul.mubr.msk.f32.vlgmr.msra.gmra.mrb[0].mxu0 %vm102_vm0, %v99_v4 }
  0x21   :  { %1980 = vmatpush3.bf16.msra.mxu0 %v1970_v3  ;;  %1848 = vmatprep.mubr.msk.f32.mxu0 %vm102_vm0, %v100_v5 }
  0x22   :  { %1985 = vmatprep.subr.bf16.mxu0 %v1970_v3 }
  0x24   :  { %1849 = vmatmul.mubr.msk.f32.vlgmr.msra.gmra.mrb[2].mxu0 %vm102_vm0, %v101_v7 }
  0x25   :  { %1987 = vmatpush3.bf16.msra.mxu0 %v1970_v3  ;;  %1862 = vmatprep.mubr.msk.f32.mxu0 %vm102_vm0, %v410_v6 }
  0x26   :  { %1992 = vmatprep.subr.bf16.mxu0 %v1970_v3 }
  0x28   :  { %1863 = vmatmul.mubr.msk.f32.vlgmr.msra.gmra.mrb[4].mxu0 %vm102_vm0, %v411_v8 }
  0x29   :  { %1994 = vmatpush3.bf16.msra.mxu0 %v1970_v3  ;;  %1876 = vmatprep.mubr.msk.f32.mxu0 %vm102_vm0, %v564_v9 }
  0x2a   :  { %1999 = vmatprep.subr.bf16.mxu0 %v1970_v3 }
  0x2c   :  { %1877 = vmatmul.mubr.msk.f32.vlgmr.msra.gmra.mrb[6].mxu0 %vm102_vm0, %v565_v10 }
  0x2d   :  { %2001 = vmatpush3.bf16.msra.mxu0 %v1970_v3  ;;  %1890 = vmatprep.mubr.msk.f32.mxu0 %vm102_vm0, %v718_v11 }
  0x2e   :  { %2006 = vmatprep.subr.bf16.mxu0 %v1970_v3 }
  0x30   :  { %1891 = vmatmul.mubr.msk.f32.vlgmr.msra.gmra.mrb[8].mxu0 %vm102_vm0, %v719_v12 }
  0x31   :  { %2008 = vmatpush3.bf16.msra.mxu0 %v1970_v3  ;;  %1904 = vmatprep.mubr.msk.f32.mxu0 %vm102_vm0, %v908_v13 }
  0x32   :  { %2013 = vmatprep.subr.bf16.mxu0 %v1970_v3 }
  0x34   :  { %1905 = vmatmul.mubr.msk.f32.vlgmr.msra.gmra.mrb[10].mxu0 %vm102_vm0, %v909_v14 }
  0x35   :  { %2015 = vmatpush3.bf16.msra.mxu0 %v1970_v3  ;;  %1918 = vmatprep.mubr.msk.f32.mxu0 %vm102_vm0, %v911_v15 }
  0x36   :  { %2020 = vmatprep.subr.bf16.mxu0 %v1970_v3 }
  0x38   :  { %1919 = vmatmul.mubr.msk.f32.vlgmr.msra.gmra.mrb[12].mxu0 %vm102_vm0, %v912_v17 }
  0x39   :  { %2022 = vmatpush3.bf16.msra.mxu0 %v1970_v3  ;;  %1932 = vmatprep.mubr.msk.f32.mxu0 %vm102_vm0, %v1217_v16 }
  0x3a   :  { %2027 = vmatprep.subr.bf16.mxu0 %v1970_v3 }
  0x3c   :  { %1933 = vmatmul.mubr.msk.f32.vlgmr.msra.gmra.mrb[14].mxu0 %vm102_vm0, %v1218_v18 }
  0x3d   :  { %2029 = vmatpush3.bf16.msra.mxu0 %v1970_v3  ;;  %1946 = vmatprep.mubr.msk.f32.mxu0 %vm102_vm0, %v1371_v19 }
  0x3e   :  { %2034 = vmatprep.subr.bf16.mxu0 %v1970_v3 }
  0x40   :  { %1947 = vmatmul.mubr.msk.f32.vlgmr.msra.gmra.mrb[16].mxu0 %vm102_vm0, %v1372_v20 }
  0x41   :  { %2036 = vmatpush3.bf16.msra.mxu0 %v1970_v3  ;;  %1960 = vmatprep.mubr.msk.f32.mxu0 %vm102_vm0, %v1525_v21 }
  0x44   :  { %1961 = vmatmul.mubr.msk.f32.vlgmr.msra.gmra.mrb[18].mxu0 %vm102_vm0, %v1526_v22 }
  0xf3   :  { %v1836_v25 = vpop.f32.mrb[0].mxu0 }
  0xf4   :  { %v175_v26 = vpop.f32.mrb[1].mxu0 }
  0xf5   :  { %v1975_v27 = vpack.c.bf16 %v1836_v25, %v175_v26 }
  0xf7   :  { %1976 = vmatpush3.bf16.msra.mxu1 %v1975_v27  ;;  %v1850_v28 = vpop.f32.mrb[2].mxu0 }
  0xf8   :  { %v330_v30 = vpop.f32.mrb[3].mxu0  ;;  %1981 = vmatprep.subr.bf16.mxu1 %v2086_v23 }
  0xf9   :  { %v1982_v31 = vpack.c.bf16 %v1850_v28, %v330_v30 }
  0xfa   :  { %1842 = vmatmul.mubr.msk.f32.vlgmr.msra.gmra.mrb[0].mxu1 %vm102_vm0, %v2153_v29 }
  0xfb   :  { %1983 = vmatpush3.bf16.msra.mxu1 %v1982_v31  ;;  %v1864_v32 = vpop.f32.mrb[4].mxu0  ;;  %1855 = vmatprep.mubr.msk.f32.mxu1 %vm2087_vm1, %v2088_v24 }
  0xfc   :  { %v484_v33 = vpop.f32.mrb[5].mxu0  ;;  %1988 = vmatprep.subr.bf16.mxu1 %v2086_v23 }
  0xfd   :  { %v1989_v34 = vpack.c.bf16 %v1864_v32, %v484_v33 }
  0xfe   :  { %1856 = vmatmul.mubr.msk.f32.vlgmr.msra.gmra.mrb[2].mxu1 %vm102_vm0, %v2153_v29 }
  0xff   :  { %1990 = vmatpush3.bf16.msra.mxu1 %v1989_v34  ;;  %v1878_v35 = vpop.f32.mrb[6].mxu0  ;;  %1869 = vmatprep.mubr.msk.f32.mxu1 %vm2087_vm1, %v2088_v24 }
 0x100   :  { %v638_v36 = vpop.f32.mrb[7].mxu0  ;;  %1995 = vmatprep.subr.bf16.mxu1 %v2086_v23 }
 0x101   :  { %v1996_v37 = vpack.c.bf16 %v1878_v35, %v638_v36 }
 0x102   :  { %1870 = vmatmul.mubr.msk.f32.vlgmr.msra.gmra.mrb[4].mxu1 %vm102_vm0, %v2153_v29 }
 0x103   :  { %1997 = vmatpush3.bf16.msra.mxu1 %v1996_v37  ;;  %v1892_v38 = vpop.f32.mrb[8].mxu0  ;;  %1883 = vmatprep.mubr.msk.f32.mxu1 %vm2087_vm1, %v2088_v24 }
 0x104   :  { %v792_v39 = vpop.f32.mrb[9].mxu0  ;;  %2002 = vmatprep.subr.bf16.mxu1 %v2086_v23 }
 0x105   :  { %v2003_v40 = vpack.c.bf16 %v1892_v38, %v792_v39 }
 0x106   :  { %1884 = vmatmul.mubr.msk.f32.vlgmr.msra.gmra.mrb[6].mxu1 %vm102_vm0, %v2153_v29 }
 0x107   :  { %2004 = vmatpush3.bf16.msra.mxu1 %v2003_v40  ;;  %v1906_v41 = vpop.f32.mrb[10].mxu0  ;;  %1897 = vmatprep.mubr.msk.f32.mxu1 %vm2087_vm1, %v2088_v24 }
 0x108   :  { %v985_v42 = vpop.f32.mrb[11].mxu0  ;;  %2009 = vmatprep.subr.bf16.mxu1 %v2086_v23 }
 0x109   :  { %v2010_v43 = vpack.c.bf16 %v1906_v41, %v985_v42 }
 0x10a   :  { %1898 = vmatmul.mubr.msk.f32.vlgmr.msra.gmra.mrb[8].mxu1 %vm102_vm0, %v2153_v29 }
 0x10b   :  { %2011 = vmatpush3.bf16.msra.mxu1 %v2010_v43  ;;  %v1920_v44 = vpop.f32.mrb[12].mxu0  ;;  %1911 = vmatprep.mubr.msk.f32.mxu1 %vm2087_vm1, %v2088_v24 }
 0x10c   :  { %v1137_v45 = vpop.f32.mrb[13].mxu0  ;;  %2016 = vmatprep.subr.bf16.mxu1 %v2086_v23 }
 0x10d   :  { %v2017_v46 = vpack.c.bf16 %v1920_v44, %v1137_v45 }
 0x10e   :  { %1912 = vmatmul.mubr.msk.f32.vlgmr.msra.gmra.mrb[10].mxu1 %vm102_vm0, %v2153_v29 }
 0x10f   :  { %2018 = vmatpush3.bf16.msra.mxu1 %v2017_v46  ;;  %v1934_v47 = vpop.f32.mrb[14].mxu0  ;;  %1925 = vmatprep.mubr.msk.f32.mxu1 %vm2087_vm1, %v2088_v24 }
 0x110   :  { %v1291_v48 = vpop.f32.mrb[15].mxu0  ;;  %2023 = vmatprep.subr.bf16.mxu1 %v2086_v23 }
 0x111   :  { %v2024_v49 = vpack.c.bf16 %v1934_v47, %v1291_v48 }
 0x112   :  { %1926 = vmatmul.mubr.msk.f32.vlgmr.msra.gmra.mrb[12].mxu1 %vm102_vm0, %v2153_v29 }
 0x113   :  { %2025 = vmatpush3.bf16.msra.mxu1 %v2024_v49  ;;  %v1948_v50 = vpop.f32.mrb[16].mxu0  ;;  %1939 = vmatprep.mubr.msk.f32.mxu1 %vm2087_vm1, %v2088_v24 }
 0x114   :  { %v1445_v51 = vpop.f32.mrb[17].mxu0  ;;  %2030 = vmatprep.subr.bf16.mxu1 %v2086_v23 }
 0x115   :  { %v2031_v52 = vpack.c.bf16 %v1948_v50, %v1445_v51 }
 0x116   :  { %1940 = vmatmul.mubr.msk.f32.vlgmr.msra.gmra.mrb[14].mxu1 %vm102_vm0, %v2153_v29 }
 0x117   :  { %2032 = vmatpush3.bf16.msra.mxu1 %v2031_v52  ;;  %v1962_v53 = vpop.f32.mrb[18].mxu0  ;;  %1953 = vmatprep.mubr.msk.f32.mxu1 %vm2087_vm1, %v2088_v24 }
 0x118   :  { %v1599_v54 = vpop.f32.mrb[19].mxu0  ;;  %2037 = vmatprep.subr.bf16.mxu1 %v2086_v23 }
 0x119   :  { %v2038_v55 = vpack.c.bf16 %v1962_v53, %v1599_v54 }
 0x11a   :  { %1954 = vmatmul.mubr.msk.f32.vlgmr.msra.gmra.mrb[16].mxu1 %vm102_vm0, %v2153_v29 }
 0x11b   :  { %2039 = vmatpush3.bf16.msra.mxu1 %v2038_v55  ;;  %1967 = vmatprep.mubr.msk.f32.mxu1 %vm2087_vm1, %v2088_v24 }
 0x11e   :  { %1968 = vmatmul.mubr.msk.f32.vlgmr.msra.gmra.mrb[18].mxu1 %vm102_vm0, %v2153_v29 }
 0x1cd   :  { %v253_v56 = vpop.f32.mrb[0].mxu1 }
 0x1ce   :  { %v257_v57 = vmul.f32 0.008264462, %v253_v56  ;;  %v1843_v58 = vpop.f32.mrb[1].mxu1 }
 0x1d0   :  { %v881_v60 = vmul.f32 2.0, %v257_v57  ;;  %v872_v0 = vmul.f32 %v257_v57, %v257_v57 }
 0x1d1   :  { %v405_v59 = vpop.f32.mrb[2].mxu1 }
 0x1d2   :  { %v409_v61 = vmul.f32 0.008264462, %v405_v59  ;;  %v1857_v62 = vpop.f32.mrb[3].mxu1 }
 0x1d4   :  { %v882_v63 = vmul.f32 %v881_v60, %v409_v61  ;;  %v875_v1 = vmul.f32 %v409_v61, %v409_v61  ;;  %v878_v2 = vmul.f32 %v409_v61, %v257_v57 }
 0x1d5   :  { %v559_v3 = vpop.f32.mrb[4].mxu1 }
 0x1d6   :  { %v563_v4 = vmul.f32 0.008264462, %v559_v3  ;;  %v1871_v5 = vpop.f32.mrb[5].mxu1  ;;  %v887_v6 = vadd.f32 %v875_v1, %v872_v0  ;;  %v883_v27 = vadd.f32 0.0001, %v882_v63 }
 0x1d8   :  { %v873_v7 = vsub.f32 %v563_v4, %v872_v0  ;;  %v888_v19 = vadd.f32 0.0001, %v887_v6  ;;  %v2089_v4 = vmov 0  }
 0x1d9   :  { %v713_v8 = vpop.f32.mrb[6].mxu1  ;;  %2060 = vset.pattern.permute.xlu1 %v2089_v4  ;;  %2061 = vset.pattern.permute.xlu0 %v2089_v4 }
 0x1da   :  { %v717_v9 = vmul.f32 0.008264462, %v713_v8  ;;  %v1885_v10 = vpop.f32.mrb[7].mxu1  ;;  %v874_v12 = vmul.f32 1.0083333, %v873_v7 }
 0x1dc   :  { %v876_v11 = vsub.f32 %v717_v9, %v875_v1 }
 0x1dd   :  { %v867_v13 = vpop.f32.mrb[8].mxu1 }
 0x1de   :  { %v877_v14 = vmul.f32 1.0083333, %v876_v11  ;;  %v871_v15 = vmul.f32 0.008264462, %v867_v13  ;;  %v1899_v16 = vpop.f32.mrb[9].mxu1 }
 0x1e0   :  { %v889_v17 = vadd.f32 %v877_v14, %v874_v12  ;;  %v879_v18 = vsub.f32 %v871_v15, %v878_v2 }
 0x1e1   :  { %v1060_v20 = vpop.f32.mrb[10].mxu1 }
 0x1e2   :  { %v890_v21 = vadd.f32 0.0009, %v889_v17  ;;  %v880_v22 = vmul.f32 1.0083333, %v879_v18  ;;  %v1064_v23 = vmul.f32 0.008264462, %v1060_v20 }
 0x1e3   :  { %v1913_v24 = vpop.f32.mrb[11].mxu1 }
 0x1e4   :  { %v891_v25 = vmul.f32 %v890_v21, %v888_v19  ;;  %v884_v26 = vmul.f32 2.0, %v880_v22  ;;  %v1688_v30 = vmul.f32 2.0, %v1064_v23  ;;  %v1679_v33 = vmul.f32 %v1064_v23, %v1064_v23 }
 0x1e5   :  { %v1212_v28 = vpop.f32.mrb[12].mxu1 }
 0x1e6   :  { %2062 = vrcp.f32 %v891_v25  ;;  %v885_v29 = vadd.f32 0.0009, %v884_v26  ;;  %v1216_v31 = vmul.f32 0.008264462, %v1212_v28  ;;  %v1927_v32 = vpop.f32.mrb[13].mxu1 }
 0x1e8   :  { %v1689_v34 = vmul.f32 %v1688_v30, %v1216_v31  ;;  %v1682_v35 = vmul.f32 %v1216_v31, %v1216_v31  ;;  %v1685_v36 = vmul.f32 %v1216_v31, %v1064_v23  ;;  %v886_v37 = vmul.f32 %v885_v29, %v883_v27 }
 0x1e9   :  { %v1366_v38 = vpop.f32.mrb[14].mxu1 }
 0x1ea   :  { %v1370_v39 = vmul.f32 0.008264462, %v1366_v38  ;;  %v1941_v40 = vpop.f32.mrb[15].mxu1  ;;  %v1694_v41 = vadd.f32 %v1682_v35, %v1679_v33  ;;  %v1690_v62 = vadd.f32 0.0001, %v1689_v34 }
 0x1ec   :  { %v1680_v42 = vsub.f32 %v1370_v39, %v1679_v33  ;;  %v1695_v57 = vadd.f32 0.0001, %v1694_v41 }
 0x1ed   :  { %v1520_v43 = vpop.f32.mrb[16].mxu1 }
 0x1ee   :  { %v1524_v44 = vmul.f32 0.008264462, %v1520_v43  ;;  %v1955_v45 = vpop.f32.mrb[17].mxu1  ;;  %v1681_v48 = vmul.f32 1.0083333, %v1680_v42 }
 0x1f0   :  { %v2063_v46 = vpop.eup %2062  ;;  %v1683_v47 = vsub.f32 %v1524_v44, %v1682_v35 }
 0x1f1   :  { %v1674_v49 = vpop.f32.mrb[18].mxu1  ;;  %v893_v50 = vmul.f32 %v2063_v46, %v886_v37 }
 0x1f2   :  { %v1684_v51 = vmul.f32 1.0083333, %v1683_v47  ;;  %v1678_v52 = vmul.f32 0.008264462, %v1674_v49  ;;  %v1969_v53 = vpop.f32.mrb[19].mxu1 }
 0x1f3   :  { %v895_v54 = vsel %vm894_vm2, %v893_v50, 0.0 }
 0x1f4   :  { %v1696_v55 = vadd.f32 %v1684_v51, %v1681_v48  ;;  %v1686_v56 = vsub.f32 %v1678_v52, %v1685_v36  ;;  %896 = vadd.xlane.f32.xlu0 %v895_v54 }
 0x1f6   :  { %v1697_v58 = vadd.f32 0.0009, %v1696_v55  ;;  %v1687_v59 = vmul.f32 1.0083333, %v1686_v56 }
 0x1f8   :  { %v1698_v60 = vmul.f32 %v1697_v58, %v1695_v57  ;;  %v1691_v61 = vmul.f32 2.0, %v1687_v59 }
 0x1fa   :  { %2064 = vrcp.f32 %v1698_v60  ;;  %v1692_v63 = vadd.f32 0.0009, %v1691_v61 }
 0x1fc   :  { %v1693_v0 = vmul.f32 %v1692_v63, %v1690_v62 }
 0x204   :  { %v2065_v1 = vpop.eup %2064 }
 0x205   :  { %v1700_v2 = vmul.f32 %v2065_v1, %v1693_v0 }
 0x207   :  { %v1701_v3 = vsel %vm894_vm2, %v1700_v2, 0.0 }
 0x208   :  { %1702 = vadd.xlane.f32.xlu0 %v1701_v3 }
 0x281   :  { %v897_v5 = vpop.xlane.xlu0 %896 }
 0x282   :  { %v899_v6 = vsel %vm898_vm3, %v897_v5, 0.0 }
 0x283   :  { %v900_v7 = vrot.slane %v899_v6, 4 }
 0x285   :  { %v901_v8 = vadd.f32 %v900_v7, %v899_v6 }
 0x287   :  { %v902_v9 = vrot.slane %v901_v8, 2 }
 0x289   :  { %v903_v12 = vadd.f32 %v902_v9, %v901_v8 }
 0x28b   :  { %v904_v15 = vrot.slane %v903_v12, 1 }
 0x28d   :  { %v905_v19 = vadd.f32 %v904_v15, %v903_v12 }
 0x28f   :  { %v906_v21 = vmul.f32 0.027777778, %v905_v19 }
 0x295   :  { %v1703_v10 = vpop.xlane.xlu0 %1702 }
 0x296   :  { %v1704_v11 = vsel %vm898_vm3, %v1703_v10, 0.0 }
 0x297   :  { %v1705_v13 = vrot.slane %v1704_v11, 4 }
 0x299   :  { %v1706_v14 = vadd.f32 %v1705_v13, %v1704_v11 }
 0x29b   :  { %v1707_v16 = vrot.slane %v1706_v14, 2 }
 0x29d   :  { %v1708_v17 = vadd.f32 %v1707_v16, %v1706_v14 }
 0x29f   :  { %v1709_v18 = vrot.slane %v1708_v17, 1 }
 0x2a1   :  { %v1710_v20 = vadd.f32 %v1709_v18, %v1708_v17 }
 0x2a3   :  { %v1711_v22 = vmul.f32 0.027777778, %v1710_v20 }
 0x2a5   :  { %v1713_v23 = vsel %vm1712_vm4, %v906_v21, %v1711_v22 }
 0x2a6   :  { %1716 = vperm.xlu1 %2060, %v1713_v23  }
 0x325   :  { %v1717_v24 = vpop.permute.xlu1 %1716 }
 0x326   :  { %1719 = vst [vmem:[%s2211_s4] sm:$0x3] %v1717_v24 }
 0x327   :  { %1724 = vsyncpa [#allocation3], 1 }
 0x328   :  { %1725 = vsyncpa [#allocation5], 1 }

</bundles_post_ra>
